<compile_context>
chip_gen: v5e
topology: v5e:2x2
jax: 0.10.0
libtpu: 0.0.40
codegen_flags: <defaults>
</compile_context>

<pallas_src>
import functools

import jax
import jax.numpy as jnp
from jax.experimental import pallas as pl
from jax.experimental.pallas import tpu as pltpu


def mha_kernel(x_ref, wqkv_ref, bqkv_ref, w1h_ref, bnn1_ref, o_ref, *,
               num_heads, head_dim, seq_len, batch_block, scale, lane_dense):
    H, h_d, N, TB = num_heads, head_dim, seq_len, batch_block
    D = H * h_d

    x = x_ref[...]                                     # (TB*N, D), native dtype
    ctype = x.dtype

    # Fused qkv projection: ONE MXU GEMM with M = TB*N rows, f32 accumulation.
    qkv = jnp.dot(x, wqkv_ref[...], preferred_element_type=jnp.float32)
    qkv = qkv + bqkv_ref[...]                          # (TB*N, 3D) f32

    # Regroup to a head-major batched layout (TB*H, N, h_d); batch index
    # b = t*H + h.  Static slice + stack only (layout plumbing done once); the
    # attention itself is a single batched contraction over all
    # (batch-element, head) pairs instead of a Python loop of tiny matmuls.
    def to_heads(channel_base):
        return jnp.stack(
            [qkv[t * N:(t + 1) * N,
                 channel_base + h * h_d:channel_base + (h + 1) * h_d]
             for t in range(TB) for h in range(H)],
            axis=0)

    # Scale q (TB*H*N*h_d elements) rather than the (TB*H*N*N) dots tensor.
    q = (to_heads(0) * scale).astype(ctype)
    k = to_heads(D).astype(ctype)
    v = to_heads(2 * D).astype(ctype)

    # Batched attention scores for every (batch element, head):   (TB*H, N, N)
    dots = jnp.einsum('bqd,bkd->bqk', q, k, preferred_element_type=jnp.float32)

    # Numerically stable softmax; divide via the approximate EUP reciprocal.
    # TODO(synk): for large N switch to a flash-style online softmax streaming
    # over KV tiles instead of materializing the full (N, N) score matrix.
    m = jnp.max(dots, axis=-1, keepdims=True)
    e = jnp.exp(dots - m)
    s = jnp.sum(e, axis=-1, keepdims=True)
    attn = e * pl.reciprocal(s, approx=True)

    # Attention-weighted values:                                  (TB*H, N, h_d)
    ov = jnp.einsum('bqk,bkd->bqd', attn.astype(ctype), v,
                    preferred_element_type=jnp.float32)

    # Head merge folded into the output projection: batched per-head matmul
    # against the head-sliced nn1 weight, then a sum over the head axis.  No
    # concatenate of H live head outputs.
    proj = jnp.einsum('bnd,bdo->bno', ov.astype(ctype), w1h_ref[...],
                      preferred_element_type=jnp.float32)   # (TB*H, N, D) f32

    bias = bnn1_ref[...]                               # (1, D)
    y_rows = [sum(proj[t * H + h] for h in range(H)) + bias
              for t in range(TB)]                      # TB x (N, D) f32

    # TODO(synk): nn.Dropout is identity in eval/inference mode; training-mode
    # stochastic masking (pltpu.prng_*) is not implemented here.

    if lane_dense:
        # Pack each batch element's (N, D) rows into one (1, N*D) lane-major row
        # so the epilogue issues unmasked full-lane stores (D=32 < 128 lanes
        # would otherwise hit masked partial stores).
        packed = [jnp.concatenate([yt[n:n + 1, :] for n in range(N)], axis=1)
                  for yt in y_rows]                    # TB x (1, N*D)
        o_ref[...] = jnp.concatenate(packed, axis=0).astype(o_ref.dtype)
    else:
        o_ref[...] = jnp.stack(y_rows, axis=0).astype(o_ref.dtype)


def _pick_batch_block(batch, seq_len, target_rows=256):
    """Batch elements per grid step so the projection GEMMs see ~128-256 rows
    (fills the MXU M dim on v5e/v6e/v7x) while still dividing the batch.  With a
    large batch this leaves >1 parallel grid step so v7x's two TensorCores both
    get work and the software pipeline has steps to overlap."""
    cap = max(1, target_rows // max(seq_len, 1))
    if batch <= cap:
        return batch
    for tb in range(min(batch, cap), 0, -1):
        if batch % tb == 0 and (tb * seq_len) % 8 == 0:
            return tb
    return batch


def multi_head_attention(x, w_qkv, b_qkv, w_nn1, b_nn1, num_heads):
    """x: (B, N, D); w_qkv: (D, 3D); b_qkv: (1, 3D); w_nn1: (D, D); b_nn1: (1, D).
    Linear weights are the PyTorch weights pre-transposed to (in, out)."""
    B, N, D = x.shape
    assert D % num_heads == 0
    h_d = D // num_heads
    scale = float(D) ** (-0.5)     # module scales by dim**-0.5 (not head_dim**-0.5)

    TB = _pick_batch_block(B, N)
    assert B % TB == 0
    grid = (B // TB,)

    # Rows = (batch, seq) so the in-kernel GEMMs see M = TB*N rows per step.
    x2 = x.reshape(B * N, D)

    # nn1 weight pre-split per head ((H, h_d, D)) and tiled over the TB batch
    # elements of a grid step so the head merge is one batched matmul in-kernel.
    w1h = jnp.tile(w_nn1.reshape(num_heads, h_d, D), (TB, 1, 1))  # (TB*H, h_d, D)

    # Lane-dense output slab when the flattened row is 128-lane aligned.
    lane_dense = (N * D) % 128 == 0 and (TB == B or TB % 8 == 0)
    if lane_dense:
        out_shape = jax.ShapeDtypeStruct((B, N * D), x.dtype)
        out_spec = pl.BlockSpec((TB, N * D), lambda i: (i, 0))
    else:
        out_shape = jax.ShapeDtypeStruct((B, N, D), x.dtype)
        out_spec = pl.BlockSpec((TB, N, D), lambda i: (i, 0, 0))

    kernel = functools.partial(
        mha_kernel, num_heads=num_heads, head_dim=h_d, seq_len=N,
        batch_block=TB, scale=scale, lane_dense=lane_dense)

    out = pl.pallas_call(
        kernel,
        out_shape=out_shape,
        grid=grid,
        in_specs=[
            pl.BlockSpec((TB * N, D), lambda i: (i, 0)),
            # Weights/biases stay VMEM-resident (tiny at D=32).
            # TODO(synk): for large D (esp. v7x's 64 MiB VMEM) tile the weight
            # reduction over an extra grid axis / pltpu.emit_pipeline instead of
            # fully resident weights, and set vmem_limit_bytes explicitly.
            pl.BlockSpec((D, 3 * D), lambda i: (0, 0)),
            pl.BlockSpec((1, 3 * D), lambda i: (0, 0)),
            pl.BlockSpec((TB * num_heads, h_d, D), lambda i: (0, 0, 0)),
            pl.BlockSpec((1, D), lambda i: (0, 0)),
        ],
        out_specs=out_spec,
        compiler_params=pltpu.CompilerParams(
            dimension_semantics=("parallel",)),
    )(x2, w_qkv, b_qkv, w1h, b_nn1)

    return out.reshape(B, N, D)


def reference_forward(x, w_qkv, b_qkv, w_nn1, b_nn1, num_heads):
    """Pure-JAX reference mirroring the PyTorch forward exactly."""
    B, N, D = x.shape
    h_d = D // num_heads
    scale = float(D) ** (-0.5)
    qkv = x @ w_qkv + b_qkv[0]                                   # (B, N, 3D)
    # channel c = i*D + head*h_d + d  (matches the permute/view in the module)
    qkv = qkv.reshape(B, N, 3, num_heads, h_d)
    q = jnp.transpose(qkv[:, :, 0], (0, 2, 1, 3))                # (B, H, N, h_d)
    k = jnp.transpose(qkv[:, :, 1], (0, 2, 1, 3))
    v = jnp.transpose(qkv[:, :, 2], (0, 2, 1, 3))
    dots = jnp.einsum('bhid,bhjd->bhij', q, k) * scale
    attn = jax.nn.softmax(dots, axis=-1)
    out = jnp.einsum('bhij,bhjd->bhid', attn, v)
    out = jnp.transpose(out, (0, 2, 1, 3)).reshape(B, N, D)
    return out @ w_nn1 + b_nn1[0]


def xavier_uniform(key, shape, fan_in, fan_out, dtype=jnp.float32):
    bound = (6.0 / (fan_in + fan_out)) ** 0.5
    return jax.random.uniform(key, shape, dtype, minval=-bound, maxval=bound)


if __name__ == "__main__":
    B, N, D, H = 2, 8, 32, 4   # batch, seq, dim, num_heads  (dim % heads == 0)

    key = jax.random.PRNGKey(0)
    kx, kqkv, knn1 = jax.random.split(key, 3)

    x = jax.random.normal(kx, (B, N, D), dtype=jnp.float32)

    # to_qkv: torch weight (3D, D), xavier_uniform, zero bias.  Stored transposed.
    w_qkv = xavier_uniform(kqkv, (D, 3 * D), fan_in=D, fan_out=3 * D)
    b_qkv = jnp.zeros((1, 3 * D), dtype=jnp.float32)
    # nn1: torch weight (D, D), xavier_uniform, zero bias.  Stored transposed.
    w_nn1 = xavier_uniform(knn1, (D, D), fan_in=D, fan_out=D)
    b_nn1 = jnp.zeros((1, D), dtype=jnp.float32)

    out = multi_head_attention(x, w_qkv, b_qkv, w_nn1, b_nn1, H)
    out = jax.block_until_ready(out)

    ref = reference_forward(x, w_qkv, b_qkv, w_nn1, b_nn1, H)
    assert out.shape == (B, N, D)
    err = float(jnp.max(jnp.abs(out - ref)))
    # approx reciprocal in the softmax trades a few ulps for the EUP fast path.
    assert jnp.allclose(out, ref, atol=5e-3, rtol=5e-3), f"max abs err = {err}"

    print("KERNEL_OK")
</pallas_src>

<mosaic_0001>
module attributes {stable_mosaic.version = 11 : i64} {
  func.func @mha_kernel(%arg0: i32, %arg1: memref<16x32xf32, #tpu.memory_space<vmem>>, %arg2: memref<32x96xf32, #tpu.memory_space<vmem>>, %arg3: memref<1x96xf32, #tpu.memory_space<vmem>>, %arg4: memref<8x8x32xf32, #tpu.memory_space<vmem>>, %arg5: memref<1x32xf32, #tpu.memory_space<vmem>>, %arg6: memref<2x256xf32, #tpu.memory_space<vmem>>) attributes {dimension_semantics = [#tpu.dimension_semantics<parallel>], iteration_bounds = array<i64: 1>, scalar_prefetch = 0 : i64, scratch_operands = 0 : i64, tpu.core_type = #tpu.core_type<tc>, window_params = [{transform_indices = @transform_0, window_bounds = array<i64: 16, 32>}, {pipeline_mode = #tpu.pipeline_mode<synchronous>, transform_indices = @transform_1, window_bounds = array<i64: 32, 96>}, {pipeline_mode = #tpu.pipeline_mode<synchronous>, transform_indices = @transform_2, window_bounds = array<i64: 1, 96>}, {pipeline_mode = #tpu.pipeline_mode<synchronous>, transform_indices = @transform_3, window_bounds = array<i64: 8, 8, 32>}, {pipeline_mode = #tpu.pipeline_mode<synchronous>, transform_indices = @transform_4, window_bounds = array<i64: 1, 32>}, {transform_indices = @transform_5, window_bounds = array<i64: 2, 256>}]} {
    %c0 = arith.constant 0 : index
    %c0_0 = arith.constant 0 : index
    %0 = vector.load %arg1[%c0, %c0_0] : memref<16x32xf32, #tpu.memory_space<vmem>>, vector<16x32xf32>
    %c0_1 = arith.constant 0 : index
    %c0_2 = arith.constant 0 : index
    %1 = vector.load %arg2[%c0_1, %c0_2] : memref<32x96xf32, #tpu.memory_space<vmem>>, vector<32x96xf32>
    %cst = arith.constant dense<0.000000e+00> : vector<16x96xf32>
    %2 = tpu.matmul %0, %1, %cst {dimension_numbers = #tpu.dot_dimension_numbers<[1], [0], [0], [1], [0, 0, 1, 1], [], []>} : vector<16x32xf32>, vector<32x96xf32>, vector<16x96xf32> -> vector<16x96xf32>
    %c0_3 = arith.constant 0 : index
    %c0_4 = arith.constant 0 : index
    %3 = vector.load %arg3[%c0_3, %c0_4] : memref<1x96xf32, #tpu.memory_space<vmem>>, vector<1x96xf32>
    %4 = vector.broadcast %3 : vector<1x96xf32> to vector<16x96xf32>
    %5 = arith.addf %2, %4 : vector<16x96xf32>
    %6 = vector.extract_strided_slice %5 {offsets = [0, 0], sizes = [8, 8], strides = [1, 1]} : vector<16x96xf32> to vector<8x8xf32>
    %7 = vector.extract_strided_slice %5 {offsets = [0, 8], sizes = [8, 8], strides = [1, 1]} : vector<16x96xf32> to vector<8x8xf32>
    %8 = vector.extract_strided_slice %5 {offsets = [0, 16], sizes = [8, 8], strides = [1, 1]} : vector<16x96xf32> to vector<8x8xf32>
    %9 = vector.extract_strided_slice %5 {offsets = [0, 24], sizes = [8, 8], strides = [1, 1]} : vector<16x96xf32> to vector<8x8xf32>
    %10 = vector.extract_strided_slice %5 {offsets = [8, 0], sizes = [8, 8], strides = [1, 1]} : vector<16x96xf32> to vector<8x8xf32>
    %11 = vector.extract_strided_slice %5 {offsets = [8, 8], sizes = [8, 8], strides = [1, 1]} : vector<16x96xf32> to vector<8x8xf32>
    %12 = vector.extract_strided_slice %5 {offsets = [8, 16], sizes = [8, 8], strides = [1, 1]} : vector<16x96xf32> to vector<8x8xf32>
    %13 = vector.extract_strided_slice %5 {offsets = [8, 24], sizes = [8, 8], strides = [1, 1]} : vector<16x96xf32> to vector<8x8xf32>
    %14 = vector.shape_cast %6 : vector<8x8xf32> to vector<1x8x8xf32>
    %15 = vector.shape_cast %7 : vector<8x8xf32> to vector<1x8x8xf32>
    %16 = vector.shape_cast %8 : vector<8x8xf32> to vector<1x8x8xf32>
    %17 = vector.shape_cast %9 : vector<8x8xf32> to vector<1x8x8xf32>
    %18 = vector.shape_cast %10 : vector<8x8xf32> to vector<1x8x8xf32>
    %19 = vector.shape_cast %11 : vector<8x8xf32> to vector<1x8x8xf32>
    %20 = vector.shape_cast %12 : vector<8x8xf32> to vector<1x8x8xf32>
    %21 = vector.shape_cast %13 : vector<8x8xf32> to vector<1x8x8xf32>
    %22 = tpu.concatenate %14, %15, %16, %17, %18, %19, %20, %21 in 0 : vector<1x8x8xf32>, vector<1x8x8xf32>, vector<1x8x8xf32>, vector<1x8x8xf32>, vector<1x8x8xf32>, vector<1x8x8xf32>, vector<1x8x8xf32>, vector<1x8x8xf32> -> vector<8x8x8xf32>
    %cst_5 = arith.constant 0.176776692 : f32
    %23 = vector.broadcast %cst_5 : f32 to vector<8x8x8xf32>
    %24 = arith.mulf %22, %23 : vector<8x8x8xf32>
    %25 = vector.extract_strided_slice %5 {offsets = [0, 32], sizes = [8, 8], strides = [1, 1]} : vector<16x96xf32> to vector<8x8xf32>
    %26 = vector.extract_strided_slice %5 {offsets = [0, 40], sizes = [8, 8], strides = [1, 1]} : vector<16x96xf32> to vector<8x8xf32>
    %27 = vector.extract_strided_slice %5 {offsets = [0, 48], sizes = [8, 8], strides = [1, 1]} : vector<16x96xf32> to vector<8x8xf32>
    %28 = vector.extract_strided_slice %5 {offsets = [0, 56], sizes = [8, 8], strides = [1, 1]} : vector<16x96xf32> to vector<8x8xf32>
    %29 = vector.extract_strided_slice %5 {offsets = [8, 32], sizes = [8, 8], strides = [1, 1]} : vector<16x96xf32> to vector<8x8xf32>
    %30 = vector.extract_strided_slice %5 {offsets = [8, 40], sizes = [8, 8], strides = [1, 1]} : vector<16x96xf32> to vector<8x8xf32>
    %31 = vector.extract_strided_slice %5 {offsets = [8, 48], sizes = [8, 8], strides = [1, 1]} : vector<16x96xf32> to vector<8x8xf32>
    %32 = vector.extract_strided_slice %5 {offsets = [8, 56], sizes = [8, 8], strides = [1, 1]} : vector<16x96xf32> to vector<8x8xf32>
    %33 = vector.shape_cast %25 : vector<8x8xf32> to vector<1x8x8xf32>
    %34 = vector.shape_cast %26 : vector<8x8xf32> to vector<1x8x8xf32>
    %35 = vector.shape_cast %27 : vector<8x8xf32> to vector<1x8x8xf32>
    %36 = vector.shape_cast %28 : vector<8x8xf32> to vector<1x8x8xf32>
    %37 = vector.shape_cast %29 : vector<8x8xf32> to vector<1x8x8xf32>
    %38 = vector.shape_cast %30 : vector<8x8xf32> to vector<1x8x8xf32>
    %39 = vector.shape_cast %31 : vector<8x8xf32> to vector<1x8x8xf32>
    %40 = vector.shape_cast %32 : vector<8x8xf32> to vector<1x8x8xf32>
    %41 = tpu.concatenate %33, %34, %35, %36, %37, %38, %39, %40 in 0 : vector<1x8x8xf32>, vector<1x8x8xf32>, vector<1x8x8xf32>, vector<1x8x8xf32>, vector<1x8x8xf32>, vector<1x8x8xf32>, vector<1x8x8xf32>, vector<1x8x8xf32> -> vector<8x8x8xf32>
    %42 = vector.extract_strided_slice %5 {offsets = [0, 64], sizes = [8, 8], strides = [1, 1]} : vector<16x96xf32> to vector<8x8xf32>
    %43 = vector.extract_strided_slice %5 {offsets = [0, 72], sizes = [8, 8], strides = [1, 1]} : vector<16x96xf32> to vector<8x8xf32>
    %44 = vector.extract_strided_slice %5 {offsets = [0, 80], sizes = [8, 8], strides = [1, 1]} : vector<16x96xf32> to vector<8x8xf32>
    %45 = vector.extract_strided_slice %5 {offsets = [0, 88], sizes = [8, 8], strides = [1, 1]} : vector<16x96xf32> to vector<8x8xf32>
    %46 = vector.extract_strided_slice %5 {offsets = [8, 64], sizes = [8, 8], strides = [1, 1]} : vector<16x96xf32> to vector<8x8xf32>
    %47 = vector.extract_strided_slice %5 {offsets = [8, 72], sizes = [8, 8], strides = [1, 1]} : vector<16x96xf32> to vector<8x8xf32>
    %48 = vector.extract_strided_slice %5 {offsets = [8, 80], sizes = [8, 8], strides = [1, 1]} : vector<16x96xf32> to vector<8x8xf32>
    %49 = vector.extract_strided_slice %5 {offsets = [8, 88], sizes = [8, 8], strides = [1, 1]} : vector<16x96xf32> to vector<8x8xf32>
    %50 = vector.shape_cast %42 : vector<8x8xf32> to vector<1x8x8xf32>
    %51 = vector.shape_cast %43 : vector<8x8xf32> to vector<1x8x8xf32>
    %52 = vector.shape_cast %44 : vector<8x8xf32> to vector<1x8x8xf32>
    %53 = vector.shape_cast %45 : vector<8x8xf32> to vector<1x8x8xf32>
    %54 = vector.shape_cast %46 : vector<8x8xf32> to vector<1x8x8xf32>
    %55 = vector.shape_cast %47 : vector<8x8xf32> to vector<1x8x8xf32>
    %56 = vector.shape_cast %48 : vector<8x8xf32> to vector<1x8x8xf32>
    %57 = vector.shape_cast %49 : vector<8x8xf32> to vector<1x8x8xf32>
    %58 = tpu.concatenate %50, %51, %52, %53, %54, %55, %56, %57 in 0 : vector<1x8x8xf32>, vector<1x8x8xf32>, vector<1x8x8xf32>, vector<1x8x8xf32>, vector<1x8x8xf32>, vector<1x8x8xf32>, vector<1x8x8xf32>, vector<1x8x8xf32> -> vector<8x8x8xf32>
    "tpu.trace_start"() <{level = 10 : i32, message = "bqd,bkd->bqk"}> : () -> ()
    %cst_6 = arith.constant dense<0.000000e+00> : vector<8x8x8xf32>
    %59 = tpu.matmul %24, %41, %cst_6 {dimension_numbers = #tpu.dot_dimension_numbers<[2], [2], [1], [1], [0, 0, 0, 1, 1, 1], [0], [0]>} : vector<8x8x8xf32>, vector<8x8x8xf32>, vector<8x8x8xf32> -> vector<8x8x8xf32>
    "tpu.trace_stop"() : () -> ()
    %cst_7 = arith.constant dense<0xFF800000> : vector<8x8xf32>
    %60 = vector.multi_reduction <maximumf>, %59, %cst_7 [2] : vector<8x8x8xf32> to vector<8x8xf32>
    %61 = vector.shape_cast %60 : vector<8x8xf32> to vector<8x8x1xf32>
    %62 = vector.broadcast %61 : vector<8x8x1xf32> to vector<8x8x8xf32>
    %63 = arith.subf %59, %62 : vector<8x8x8xf32>
    %64 = math.exp %63 : vector<8x8x8xf32>
    %cst_8 = arith.constant dense<0.000000e+00> : vector<8x8xf32>
    %65 = vector.multi_reduction <add>, %64, %cst_8 [2] : vector<8x8x8xf32> to vector<8x8xf32>
    %66 = vector.shape_cast %65 : vector<8x8xf32> to vector<8x8x1xf32>
    %67 = tpu.reciprocal %66 {approx = true} : vector<8x8x1xf32> -> vector<8x8x1xf32>
    %68 = vector.broadcast %67 : vector<8x8x1xf32> to vector<8x8x8xf32>
    %69 = arith.mulf %64, %68 : vector<8x8x8xf32>
    "tpu.trace_start"() <{level = 10 : i32, message = "bqk,bkd->bqd"}> : () -> ()
    %cst_9 = arith.constant dense<0.000000e+00> : vector<8x8x8xf32>
    %70 = tpu.matmul %69, %58, %cst_9 {dimension_numbers = #tpu.dot_dimension_numbers<[2], [1], [1], [2], [0, 0, 0, 1, 1, 2], [0], [0]>} : vector<8x8x8xf32>, vector<8x8x8xf32>, vector<8x8x8xf32> -> vector<8x8x8xf32>
    "tpu.trace_stop"() : () -> ()
    %c0_10 = arith.constant 0 : index
    %c0_11 = arith.constant 0 : index
    %c0_12 = arith.constant 0 : index
    %71 = vector.load %arg4[%c0_10, %c0_11, %c0_12] : memref<8x8x32xf32, #tpu.memory_space<vmem>>, vector<8x8x32xf32>
    "tpu.trace_start"() <{level = 10 : i32, message = "bnd,bdo->bno"}> : () -> ()
    %cst_13 = arith.constant dense<0.000000e+00> : vector<8x8x32xf32>
    %72 = tpu.matmul %70, %71, %cst_13 {dimension_numbers = #tpu.dot_dimension_numbers<[2], [1], [1], [2], [0, 0, 0, 1, 1, 2], [0], [0]>} : vector<8x8x8xf32>, vector<8x8x32xf32>, vector<8x8x32xf32> -> vector<8x8x32xf32>
    "tpu.trace_stop"() : () -> ()
    %c0_14 = arith.constant 0 : index
    %c0_15 = arith.constant 0 : index
    %73 = vector.load %arg5[%c0_14, %c0_15] : memref<1x32xf32, #tpu.memory_space<vmem>>, vector<1x32xf32>
    %74 = vector.extract_strided_slice %72 {offsets = [0, 0, 0], sizes = [1, 8, 32], strides = [1, 1, 1]} : vector<8x8x32xf32> to vector<1x8x32xf32>
    %75 = vector.shape_cast %74 : vector<1x8x32xf32> to vector<8x32xf32>
    %cst_16 = arith.constant 0.000000e+00 : f32
    %76 = vector.broadcast %cst_16 : f32 to vector<8x32xf32>
    %77 = arith.addf %76, %75 : vector<8x32xf32>
    %78 = vector.extract_strided_slice %72 {offsets = [1, 0, 0], sizes = [1, 8, 32], strides = [1, 1, 1]} : vector<8x8x32xf32> to vector<1x8x32xf32>
    %79 = vector.shape_cast %78 : vector<1x8x32xf32> to vector<8x32xf32>
    %80 = arith.addf %77, %79 : vector<8x32xf32>
    %81 = vector.extract_strided_slice %72 {offsets = [2, 0, 0], sizes = [1, 8, 32], strides = [1, 1, 1]} : vector<8x8x32xf32> to vector<1x8x32xf32>
    %82 = vector.shape_cast %81 : vector<1x8x32xf32> to vector<8x32xf32>
    %83 = arith.addf %80, %82 : vector<8x32xf32>
    %84 = vector.extract_strided_slice %72 {offsets = [3, 0, 0], sizes = [1, 8, 32], strides = [1, 1, 1]} : vector<8x8x32xf32> to vector<1x8x32xf32>
    %85 = vector.shape_cast %84 : vector<1x8x32xf32> to vector<8x32xf32>
    %86 = arith.addf %83, %85 : vector<8x32xf32>
    %87 = vector.broadcast %73 : vector<1x32xf32> to vector<8x32xf32>
    %88 = arith.addf %86, %87 : vector<8x32xf32>
    %89 = vector.extract_strided_slice %72 {offsets = [4, 0, 0], sizes = [1, 8, 32], strides = [1, 1, 1]} : vector<8x8x32xf32> to vector<1x8x32xf32>
    %90 = vector.shape_cast %89 : vector<1x8x32xf32> to vector<8x32xf32>
    %cst_17 = arith.constant 0.000000e+00 : f32
    %91 = vector.broadcast %cst_17 : f32 to vector<8x32xf32>
    %92 = arith.addf %91, %90 : vector<8x32xf32>
    %93 = vector.extract_strided_slice %72 {offsets = [5, 0, 0], sizes = [1, 8, 32], strides = [1, 1, 1]} : vector<8x8x32xf32> to vector<1x8x32xf32>
    %94 = vector.shape_cast %93 : vector<1x8x32xf32> to vector<8x32xf32>
    %95 = arith.addf %92, %94 : vector<8x32xf32>
    %96 = vector.extract_strided_slice %72 {offsets = [6, 0, 0], sizes = [1, 8, 32], strides = [1, 1, 1]} : vector<8x8x32xf32> to vector<1x8x32xf32>
    %97 = vector.shape_cast %96 : vector<1x8x32xf32> to vector<8x32xf32>
    %98 = arith.addf %95, %97 : vector<8x32xf32>
    %99 = vector.extract_strided_slice %72 {offsets = [7, 0, 0], sizes = [1, 8, 32], strides = [1, 1, 1]} : vector<8x8x32xf32> to vector<1x8x32xf32>
    %100 = vector.shape_cast %99 : vector<1x8x32xf32> to vector<8x32xf32>
    %101 = arith.addf %98, %100 : vector<8x32xf32>
    %102 = vector.broadcast %73 : vector<1x32xf32> to vector<8x32xf32>
    %103 = arith.addf %101, %102 : vector<8x32xf32>
    %104 = vector.extract_strided_slice %88 {offsets = [0, 0], sizes = [1, 32], strides = [1, 1]} : vector<8x32xf32> to vector<1x32xf32>
    %105 = vector.extract_strided_slice %88 {offsets = [1, 0], sizes = [1, 32], strides = [1, 1]} : vector<8x32xf32> to vector<1x32xf32>
    %106 = vector.extract_strided_slice %88 {offsets = [2, 0], sizes = [1, 32], strides = [1, 1]} : vector<8x32xf32> to vector<1x32xf32>
    %107 = vector.extract_strided_slice %88 {offsets = [3, 0], sizes = [1, 32], strides = [1, 1]} : vector<8x32xf32> to vector<1x32xf32>
    %108 = vector.extract_strided_slice %88 {offsets = [4, 0], sizes = [1, 32], strides = [1, 1]} : vector<8x32xf32> to vector<1x32xf32>
    %109 = vector.extract_strided_slice %88 {offsets = [5, 0], sizes = [1, 32], strides = [1, 1]} : vector<8x32xf32> to vector<1x32xf32>
    %110 = vector.extract_strided_slice %88 {offsets = [6, 0], sizes = [1, 32], strides = [1, 1]} : vector<8x32xf32> to vector<1x32xf32>
    %111 = vector.extract_strided_slice %88 {offsets = [7, 0], sizes = [1, 32], strides = [1, 1]} : vector<8x32xf32> to vector<1x32xf32>
    %112 = tpu.concatenate %104, %105, %106, %107, %108, %109, %110, %111 in 1 : vector<1x32xf32>, vector<1x32xf32>, vector<1x32xf32>, vector<1x32xf32>, vector<1x32xf32>, vector<1x32xf32>, vector<1x32xf32>, vector<1x32xf32> -> vector<1x256xf32>
    %113 = vector.extract_strided_slice %103 {offsets = [0, 0], sizes = [1, 32], strides = [1, 1]} : vector<8x32xf32> to vector<1x32xf32>
    %114 = vector.extract_strided_slice %103 {offsets = [1, 0], sizes = [1, 32], strides = [1, 1]} : vector<8x32xf32> to vector<1x32xf32>
    %115 = vector.extract_strided_slice %103 {offsets = [2, 0], sizes = [1, 32], strides = [1, 1]} : vector<8x32xf32> to vector<1x32xf32>
    %116 = vector.extract_strided_slice %103 {offsets = [3, 0], sizes = [1, 32], strides = [1, 1]} : vector<8x32xf32> to vector<1x32xf32>
    %117 = vector.extract_strided_slice %103 {offsets = [4, 0], sizes = [1, 32], strides = [1, 1]} : vector<8x32xf32> to vector<1x32xf32>
    %118 = vector.extract_strided_slice %103 {offsets = [5, 0], sizes = [1, 32], strides = [1, 1]} : vector<8x32xf32> to vector<1x32xf32>
    %119 = vector.extract_strided_slice %103 {offsets = [6, 0], sizes = [1, 32], strides = [1, 1]} : vector<8x32xf32> to vector<1x32xf32>
    %120 = vector.extract_strided_slice %103 {offsets = [7, 0], sizes = [1, 32], strides = [1, 1]} : vector<8x32xf32> to vector<1x32xf32>
    %121 = tpu.concatenate %113, %114, %115, %116, %117, %118, %119, %120 in 1 : vector<1x32xf32>, vector<1x32xf32>, vector<1x32xf32>, vector<1x32xf32>, vector<1x32xf32>, vector<1x32xf32>, vector<1x32xf32>, vector<1x32xf32> -> vector<1x256xf32>
    %122 = tpu.concatenate %112, %121 in 0 : vector<1x256xf32>, vector<1x256xf32> -> vector<2x256xf32>
    %c0_18 = arith.constant 0 : index
    %c0_19 = arith.constant 0 : index
    %123 = vector.load %arg6[%c0_18, %c0_19] : memref<2x256xf32, #tpu.memory_space<vmem>>, vector<2x256xf32>
    tpu.vector_store %arg6[%c0_18, %c0_19], %122 {strides = array<i32>} : memref<2x256xf32, #tpu.memory_space<vmem>>, vector<2x256xf32>,
    return
  }
  func.func @transform_0(%arg0: i32) -> (i32, i32) {
    %c0_i32 = arith.constant 0 : i32
    %c0_i32_0 = arith.constant 0 : i32
    return %arg0, %c0_i32 : i32, i32
  }
  func.func @transform_1(%arg0: i32) -> (i32, i32) {
    %c0_i32 = arith.constant 0 : i32
    %c0_i32_0 = arith.constant 0 : i32
    %c0_i32_1 = arith.constant 0 : i32
    return %c0_i32, %c0_i32_0 : i32, i32
  }
  func.func @transform_2(%arg0: i32) -> (i32, i32) {
    %c0_i32 = arith.constant 0 : i32
    %c0_i32_0 = arith.constant 0 : i32
    %c0_i32_1 = arith.constant 0 : i32
    return %c0_i32, %c0_i32_0 : i32, i32
  }
  func.func @transform_3(%arg0: i32) -> (i32, i32, i32) {
    %c0_i32 = arith.constant 0 : i32
    %c0_i32_0 = arith.constant 0 : i32
    %c0_i32_1 = arith.constant 0 : i32
    %c0_i32_2 = arith.constant 0 : i32
    return %c0_i32, %c0_i32_0, %c0_i32_1 : i32, i32, i32
  }
  func.func @transform_4(%arg0: i32) -> (i32, i32) {
    %c0_i32 = arith.constant 0 : i32
    %c0_i32_0 = arith.constant 0 : i32
    %c0_i32_1 = arith.constant 0 : i32
    return %c0_i32, %c0_i32_0 : i32, i32
  }
  func.func @transform_5(%arg0: i32) -> (i32, i32) {
    %c0_i32 = arith.constant 0 : i32
    %c0_i32_0 = arith.constant 0 : i32
    return %arg0, %c0_i32 : i32, i32
  }
}

</mosaic_0001>

<bundles_post_ra>
// kernel: tpu_custom_call.1
= control target key start
LH: loop header
LB: loop body
LE: loop exit
PB: predicated region body
PF: predicated region fallthrough
CT: control target
= control target key end

     0   :  { %10 = vsyncpa [#allocation3], 0  ;;  %s1371_s0 = inlined_call_operand.hbm [shape: f32[16,32], index: 0, kind: input, shape index: {}]   ;;  %s1372_s1 = inlined_call_operand.hbm [shape: f32[32,96], index: 1, kind: input, shape index: {}]   ;;  %s1373_s2 = inlined_call_operand.vmem [shape: f32[1,96], index: 2, kind: input, shape index: {}]   ;;  %s1374_s3 = inlined_call_operand.hbm [shape: f32[8,8,32], index: 3, kind: input, shape index: {}]   ;;  %s1375_s4 = inlined_call_operand.vmem [shape: f32[1,32], index: 4, kind: input, shape index: {}]   ;;  %s1376_s5 = inlined_call_operand.hbm [shape: f32[2,256], index: 5, kind: output, shape index: {}]  }
   0x1   :  { %11 = vsyncpa [#allocation6], 0 }
   0x2   :  { %12 = vsyncpa [#allocation4], 0  ;;  %s30_s20 = sshll.u32 %s1372_s1, 4  ;;  %s1159_s21 = smov [#allocation5]   ;;  %s31_s20 = int_to_ptr.hbm [resolvable:$true] %s30_s20 }
   0x3   :  { %s32_s22 = sshll.u32 %s1159_s21, 4  ;;  %s17_s25 = sshll.u32 %s1371_s0, 4  ;;  %s33_s22 = int_to_ptr.vmem [resolvable:$true] %s32_s22  ;;  %s18_s25 = int_to_ptr.hbm [resolvable:$true] %s17_s25 }
   0x4   :  { %s1160_s26 = smov 128   ;;  %s1161_s27 = smov 8  }
   0x5   :  { %38 = dma.hbm_to_vmem [thread:$0]  %s31_s20, 512, %s33_s22, [#allocation6], %s1160_s26, %s1160_s26, %s1161_s27  }
   0x6   :  { %s1162_s28 = smov [#allocation2]   ;;  %s45_s7 = sshll.u32 %s1374_s3, 4  ;;  %s46_s7 = int_to_ptr.hbm [resolvable:$true] %s45_s7 }
   0x7   :  { %s19_s29 = sshll.u32 %s1162_s28, 4  ;;  %s1163_s1 = smov [#allocation7]   ;;  %s20_s29 = int_to_ptr.vmem [resolvable:$true] %s19_s29 }
   0x8   :  { %25 = dma.hbm_to_vmem [thread:$0]  %s18_s25, 256, %s20_s29, [#allocation3], %s1160_s26, %s1160_s26, %s1161_s27  }
   0x9   :  { %s47_s8 = sshll.u32 %s1163_s1, 4  ;;  %s48_s8 = int_to_ptr.vmem [resolvable:$true] %s47_s8 }
   0xa   :  { %53 = dma.hbm_to_vmem [thread:$0]  %s46_s7, 1024, %s48_s8, [#allocation6], %s1160_s26, %s1160_s26, %s1161_s27  }
   0xb   :  { %1153 = dma.done.wait [#allocation3], 256  }
   0xc   :  { %1154 = vsyncadd [#allocation3], 4294967040 }
   0xd   :  { %1155 = dma.done.wait [#allocation6], 1536  }
   0xe   :  { %1156 = vsyncadd [#allocation6], 4294965760  ;;  %v73_v0 = vld [vmem:[#allocation5 + $0x18] sm:$0xff]  ;;  %v72_v1 = vld [vmem:[#allocation5 + $0x10] sm:$0xff]  ;;  %vm78_vm0 = vcmask 261120   ;;  %s1164_s9 = smov 112  }
   0xf   :  { %97 = vmatpush.msra.mxu0 %v73_v0  ;;  %v71_v2 = vld [vmem:[#allocation5 + $0x8] sm:$0xff]  ;;  %v70_v3 = vld [vmem:[#allocation5] sm:$0xff]  ;;  %v68_v4 = vld [vmem:[#allocation2] sm:$0xff]  ;;  %s1165_s10 = smov 120   ;;  %s1166_s11 = smov 104   ;;  %vm138_vm1 = vcmask 64512  }
  0x10   :  { %v69_v5 = vld [vmem:[#allocation2 + $0x8] sm:$0xff]  ;;  %v1023_v6 = vld [vmem:[%s1373_s2] ss:$0 sm:$0xff]  ;;  %s1167_s2 = smov 96   ;;  %s1168_s12 = smov 64   ;;  %vm883_vm2 = vcmask 523264  }
  0x11   :  { %98 = vmatpush.msra.mxu0 %v72_v1  ;;  %s1169_s15 = smov 32   ;;  %vm885_vm3 = vcmask 785408   ;;  %vm929_vm4 = vcmask 1040384   ;;  %s946_s19 = sshll.u32 %s1376_s5, 4  ;;  %vm935_vm5 = vcmask 1041408   ;;  %s947_s19 = int_to_ptr.hbm [resolvable:$true] %s946_s19 }
  0x13   :  { %99 = vmatpush.msra.mxu0 %v71_v2 }
  0x15   :  { %100 = vmatpush.msra.mxu0 %v70_v3 }
  0x16   :  { %957 = vmatmul.msk.f32.vlgmr.msra.gmra.mxu0 %vm78_vm0, %v68_v4 }
  0x1e   :  { %958 = vmatmul.msk.f32.gmra.mxu0 %vm78_vm0, %v69_v5 }
  0x93   :  { %v102_v7 = vpop.f32.mrf.mxu0 }
  0x94   :  { %v1215_v8 = vadd.f32 %v1023_v6, %v102_v7 }
  0x96   :  { %112 = vrot.lane.b32.xlu1 %v1215_v8, %s1164_s9  ;;  %109 = vrot.lane.b32.xlu0 %v1215_v8, %s1165_s10  ;;  %v128_v20 = vmul.f32 0.17677669, %v1215_v8 }
  0x9b   :  { %v105_v9 = vpop.f32.mrf.mxu0 }
  0x9c   :  { %v1219_v10 = vadd.f32 %v1023_v6, %v105_v9 }
  0x9e   :  { %125 = vrot.lane.b32.xlu1 %v1219_v10, %s1166_s11  ;;  %115 = vrot.lane.b32.xlu0 %v1215_v8, %s1166_s11  ;;  %v132_v30 = vmul.f32 0.17677669, %v1219_v10 }
  0x9f   :  { %119 = vrot.lane.b32.xlu2 %v1219_v10, %s1165_s10 }
  0xa6   :  { %136 = vrot.lane.b32.xlu1 %v1215_v8, %s1167_s2 }
  0xa7   :  { %122 = vrot.lane.b32.xlu2 %v1219_v10, %s1164_s9 }
  0xaf   :  { %245 = vrot.lane.b32.xlu2 %v1219_v10, %s1167_s2 }
  0xf9   :  { %v1229_v11 = vpop.permute.xlu2 %119 }
  0xfa   :  { %v133_v32 = vmul.f32 0.17677669, %v1229_v11 }
 0x101   :  { %v1231_v12 = vpop.permute.xlu2 %122 }
 0x102   :  { %v1018_v13 = vpack.i.bf16 %v1231_v12, %v1229_v11  ;;  %v134_v33 = vmul.f32 0.17677669, %v1231_v12 }
 0x108   :  { %v1235_v14 = vpop.permute.xlu1 %112  ;;  %v1237_v15 = vpop.permute.xlu0 %109 }
 0x109   :  { %191 = vrot.lane.b32.xlu1 %v1235_v14, %s1167_s2  ;;  %164 = vrot.lane.b32.xlu0 %v1237_v15, %s1167_s2  ;;  %v246_v21 = vpop.permute.xlu2 %245  ;;  %v130_v24 = vmul.f32 0.17677669, %v1235_v14  ;;  %v129_v25 = vmul.f32 0.17677669, %v1237_v15 }
 0x110   :  { %v1243_v16 = vpop.permute.xlu1 %125  ;;  %v1245_v17 = vpop.permute.xlu0 %115 }
 0x111   :  { %v1013_v18 = vpack.i.bf16 %v1235_v14, %v1243_v16  ;;  %299 = vrot.lane.b32.xlu1 %v1231_v12, %s1167_s2  ;;  %218 = vrot.lane.b32.xlu0 %v1245_v17, %s1167_s2  ;;  %v131_v29 = vmul.f32 0.17677669, %v1245_v17  ;;  %v135_v34 = vmul.f32 0.17677669, %v1243_v16  ;;  %v1003_v56 = vpack.i.bf16 %v1245_v17, %v1215_v8 }
 0x112   :  { %326 = vrot.lane.b32.xlu2 %v1243_v16, %s1167_s2 }
 0x118   :  { %v137_v19 = vpop.permute.xlu1 %136 }
 0x119   :  { %959 = vmatpush.xpose.msk.msra.mxu1 %vm138_vm1, %v137_v19  ;;  %272 = vrot.lane.b32.xlu0 %v1229_v11, %s1167_s2 }
 0x11c   :  { %960 = vmatmul.msk.f32.vlgmr.msra.gmra.mxu1 %vm138_vm1, %v128_v20 }
 0x16c   :  { %v327_v26 = vpop.permute.xlu2 %326 }
 0x17b   :  { %v192_v22 = vpop.permute.xlu1 %191  ;;  %v165_v23 = vpop.permute.xlu0 %164 }
 0x17c   :  { %961 = vmatpush.xpose.msk.msra.mxu2 %vm138_vm1, %v165_v23  ;;  %963 = vmatpush.xpose.msk.msra.mxu3 %vm138_vm1, %v192_v22 }
 0x17f   :  { %962 = vmatmul.msk.f32.vlgmr.msra.gmra.mxu2 %vm138_vm1, %v129_v25  ;;  %964 = vmatmul.msk.f32.vlgmr.msra.gmra.mxu3 %vm138_vm1, %v130_v24 }
 0x180   :  { %967 = vmatpush.xpose.msk.msrb.mxu2 %vm138_vm1, %v246_v21 }
 0x183   :  { %v300_v27 = vpop.permute.xlu1 %299  ;;  %v219_v28 = vpop.permute.xlu0 %218 }
 0x184   :  { %973 = vmatpush.xpose.msk.msra.mxu2 %vm138_vm1, %v327_v26  ;;  %965 = vmatpush.xpose.msk.msrb.mxu1 %vm138_vm1, %v219_v28 }
 0x187   :  { %966 = vmatmul.msk.f32.vlgmr.msrb.gmra.mxu1 %vm138_vm1, %v131_v29  ;;  %968 = vmatmul.msk.f32.vlgmr.msrb.gmra.mxu2 %vm138_vm1, %v132_v30 }
 0x188   :  { %971 = vmatpush.xpose.msk.msra.mxu1 %vm138_vm1, %v300_v27 }
 0x18b   :  { %v273_v31 = vpop.permute.xlu0 %272 }
 0x18c   :  { %969 = vmatpush.xpose.msk.msrb.mxu3 %vm138_vm1, %v273_v31 }
 0x18f   :  { %970 = vmatmul.msk.f32.vlgmr.msrb.gmra.mxu3 %vm138_vm1, %v133_v32  ;;  %972 = vmatmul.msk.f32.vlgmr.msra.gmra.mxu1 %vm138_vm1, %v134_v33 }
 0x190   :  { %974 = vmatmul.msk.f32.vlgmr.msra.gmra.mxu2 %vm138_vm1, %v135_v34 }
 0x199   :  { %v161_v35 = vpop.f32.mrf.mxu1 }
 0x19a   :  { %v353_v36 = vsel %vm138_vm1, %v161_v35, -inf }
 0x19b   :  { %354 = vmax.xlane.f32.xlu2 %v353_v36 }
 0x202   :  { %v188_v37 = vpop.f32.mrf.mxu2  ;;  %v215_v41 = vpop.f32.mrf.mxu3 }
 0x203   :  { %v356_v38 = vsel %vm138_vm1, %v188_v37, -inf  ;;  %v359_v45 = vsel %vm138_vm1, %v215_v41, -inf }
 0x204   :  { %357 = vmax.xlane.f32.xlu2 %v356_v38  ;;  %v242_v39 = vpop.f32.mrf.mxu1 }
 0x205   :  { %v362_v40 = vsel %vm138_vm1, %v242_v39, -inf }
 0x206   :  { %363 = vmax.xlane.f32.xlu0 %v362_v40 }
 0x20a   :  { %v269_v42 = vpop.f32.mrf.mxu2 }
 0x20b   :  { %v365_v43 = vsel %vm138_vm1, %v269_v42, -inf }
 0x20c   :  { %366 = vmax.xlane.f32.xlu1 %v365_v43  ;;  %v1285_v44 = vpop.f32.mrf.mxu1 }
 0x20d   :  { %v371_v46 = vsel %vm138_vm1, %v1285_v44, -inf }
 0x20e   :  { %v355_v47 = vpop.xlane.xlu2 %354  ;;  %360 = vmax.xlane.f32.xlu0 %v359_v45  ;;  %372 = vmax.xlane.f32.xlu2 %v371_v46 }
 0x20f   :  { %v377_v48 = vsub.f32 %v161_v35, %v355_v47 }
 0x211   :  { %v385_v49 = vmul.f32 1.442695, %v377_v48 }
 0x212   :  { %v296_v50 = vpop.f32.mrf.mxu3 }
 0x213   :  { %1025 = vpow2.f32 %v385_v49  ;;  %v350_v51 = vpop.f32.mrf.mxu2  ;;  %v368_v52 = vsel %vm138_vm1, %v296_v50, -inf }
 0x214   :  { %369 = vmax.xlane.f32.xlu1 %v368_v52  ;;  %v374_v53 = vsel %vm138_vm1, %v350_v51, -inf }
 0x216   :  { %375 = vmax.xlane.f32.xlu2 %v374_v53 }
 0x219   :  { %v1026_v54 = vpop.eup %1025 }
 0x21a   :  { %v401_v55 = vsel %vm138_vm1, %v1026_v54, 0.0 }
 0x21b   :  { %402 = vadd.xlane.f32.xlu0 %v401_v55 }
 0x22f   :  { %1004 = vrot.lane.b32.xlu0 %v1003_v56, %s1168_s12 }
 0x237   :  { %1014 = vrot.lane.b32.xlu0 %v1013_v18, %s1168_s12 }
 0x23f   :  { %1019 = vrot.lane.b32.xlu0 %v1018_v13, %s1168_s12 }
 0x277   :  { %v358_v57 = vpop.xlane.xlu2 %357 }
 0x278   :  { %v378_v60 = vsub.f32 %v188_v37, %v358_v57 }
 0x279   :  { %v364_v58 = vpop.xlane.xlu0 %363 }
 0x27a   :  { %v380_v59 = vsub.f32 %v242_v39, %v364_v58  ;;  %v387_v62 = vmul.f32 1.442695, %v378_v60  ;;  %v1008_v39 = vpack.i.bf16 %v1237_v15, %v1219_v10  ;;  %v649_v60 = vld [vmem:[#allocation7] sm:$0xff] }
 0x27c   :  { %v391_v61 = vmul.f32 1.442695, %v380_v59 }
 0x27e   :  { %1027 = vpow2.f32 %v391_v61 }
 0x27f   :  { %v367_v63 = vpop.xlane.xlu1 %366  ;;  %1029 = vpow2.f32 %v387_v62 }
 0x280   :  { %v381_v0 = vsub.f32 %v269_v42, %v367_v63 }
 0x281   :  { %v361_v1 = vpop.xlane.xlu0 %360  ;;  %v373_v2 = vpop.xlane.xlu2 %372 }
 0x282   :  { %v393_v3 = vmul.f32 1.442695, %v381_v0  ;;  %v379_v5 = vsub.f32 %v215_v41, %v361_v1  ;;  %v383_v22 = vsub.f32 %v1285_v44, %v373_v2 }
 0x284   :  { %v1028_v4 = vpop.eup %1027  ;;  %1031 = vpow2.f32 %v393_v3  ;;  %v389_v7 = vmul.f32 1.442695, %v379_v5  ;;  %v397_v26 = vmul.f32 1.442695, %v383_v22  ;;  %v652_v3 = vld [vmem:[#allocation7 + $0x18] sm:$0xff]  ;;  %v650_v5 = vld [vmem:[#allocation7 + $0x8] sm:$0xff] }
 0x285   :  { %v410_v6 = vsel %vm138_vm1, %v1028_v4, 0.0  ;;  %v1305_v8 = vpop.eup %1029 }
 0x286   :  { %411 = vadd.xlane.f32.xlu1 %v410_v6  ;;  %1033 = vpow2.f32 %v389_v7  ;;  %v404_v18 = vsel %vm138_vm1, %v1305_v8, 0.0  ;;  %v656_v6 = vld [vmem:[#allocation7 + $0x38] sm:$0xff]  ;;  %v653_v7 = vld [vmem:[#allocation7 + $0x20] sm:$0xff] }
 0x287   :  { %v370_v9 = vpop.xlane.xlu1 %369 }
 0x288   :  { %v382_v16 = vsub.f32 %v296_v50, %v370_v9  ;;  %v655_v9 = vld [vmem:[#allocation7 + $0x30] sm:$0xff] }
 0x289   :  { %v376_v11 = vpop.xlane.xlu2 %375 }
 0x28a   :  { %v1307_v12 = vpop.eup %1031  ;;  %v384_v13 = vsub.f32 %v350_v51, %v376_v11  ;;  %v395_v19 = vmul.f32 1.442695, %v382_v16 }
 0x28b   :  { %v413_v14 = vsel %vm138_vm1, %v1307_v12, 0.0 }
 0x28c   :  { %v399_v17 = vmul.f32 1.442695, %v384_v13  ;;  %414 = vadd.xlane.f32.xlu2 %v413_v14  ;;  %v1034_v20 = vpop.eup %1033 }
 0x28d   :  { %v407_v23 = vsel %vm138_vm1, %v1034_v20, 0.0 }
 0x28e   :  { %1035 = vpow2.f32 %v399_v17  ;;  %405 = vadd.xlane.f32.xlu1 %v404_v18  ;;  %v403_v25 = vpop.xlane.xlu0 %402 }
 0x28f   :  { %1037 = vpow2.f32 %v395_v19 }
 0x290   :  { %1039 = vrcp.f32 %v403_v25 }
 0x291   :  { %1041 = vpow2.f32 %v397_v26 }
 0x294   :  { %v1036_v21 = vpop.eup %1035 }
 0x295   :  { %v422_v24 = vsel %vm138_vm1, %v1036_v21, 0.0  ;;  %v1316_v27 = vpop.eup %1037 }
 0x296   :  { %408 = vadd.xlane.f32.xlu1 %v407_v23  ;;  %423 = vadd.xlane.f32.xlu2 %v422_v24  ;;  %v416_v28 = vsel %vm138_vm1, %v1316_v27, 0.0  ;;  %v1040_v29 = vpop.eup %1039  ;;  %v1024_v24 = vld [vmem:[%s1375_s4] ss:$0 sm:$0xff]  ;;  %s1170_s4 = smov [#allocation8]  }
 0x297   :  { %v1042_v31 = vpop.eup %1041  ;;  %v433_v34 = vmul.f32 %v1040_v29, %v1026_v54  ;;  %s944_s16 = sshll.u32 %s1170_s4, 4  ;;  %s945_s16 = int_to_ptr.vmem [resolvable:$true] %s944_s16 }
 0x298   :  { %v419_v35 = vsel %vm138_vm1, %v1042_v31, 0.0 }
 0x29e   :  { %417 = vadd.xlane.f32.xlu1 %v416_v28 }
 0x2a1   :  { %v1005_v30 = vpop.permute.xlu0 %1004 }
 0x2a2   :  { %v1007_v32 = vunpack.i.h.bf16 %v1005_v30  ;;  %v1006_v33 = vunpack.i.l.bf16 %v1005_v30 }
 0x2a4   :  { %462 = vmatpush.msra.mxu3 %v1006_v33  ;;  %540 = vmatpush.msrb.mxu2 %v1007_v32 }
 0x2a5   :  { %975 = vmatmul.msk.f32.vlgmr.msra.gmra.mxu3 %vm138_vm1, %v433_v34 }
 0x2a6   :  { %420 = vadd.xlane.f32.xlu1 %v419_v35 }
 0x2a9   :  { %v1015_v36 = vpop.permute.xlu0 %1014 }
 0x2aa   :  { %v1017_v37 = vunpack.i.h.bf16 %v1015_v36  ;;  %v1016_v38 = vunpack.i.l.bf16 %v1015_v36 }
 0x2ac   :  { %514 = vmatpush.msrb.mxu1 %v1017_v37  ;;  %644 = vmatpush.msra.mxu2 %v1016_v38 }
 0x2ae   :  { %1009 = vrot.lane.b32.xlu2 %v1008_v39, %s1168_s12 }
 0x2b1   :  { %v1020_v40 = vpop.permute.xlu0 %1019 }
 0x2b2   :  { %v1022_v41 = vunpack.i.h.bf16 %v1020_v40  ;;  %v1021_v58 = vunpack.i.l.bf16 %v1020_v40 }
 0x2b4   :  { %618 = vmatpush.msra.mxu1 %v1022_v41 }
 0x2f9   :  { %v412_v42 = vpop.xlane.xlu1 %411 }
 0x2fa   :  { %1043 = vrcp.f32 %v412_v42 }
 0x2ff   :  { %v415_v45 = vpop.xlane.xlu2 %414 }
 0x300   :  { %v1044_v43 = vpop.eup %1043  ;;  %1045 = vrcp.f32 %v415_v45 }
 0x301   :  { %v436_v44 = vmul.f32 %v1044_v43, %v1028_v4  ;;  %v406_v46 = vpop.xlane.xlu1 %405  ;;  %v651_v4 = vld [vmem:[#allocation7 + $0x10] sm:$0xff] }
 0x302   :  { %1047 = vrcp.f32 %v406_v46 }
 0x303   :  { %978 = vmatmul.msk.f32.vlgmr.msrb.gmra.mxu2 %vm138_vm1, %v436_v44 }
 0x304   :  { %744 = vmatpush.msrb.mxu2 %v652_v3 }
 0x306   :  { %v1046_v10 = vpop.eup %1045 }
 0x307   :  { %v437_v59 = vmul.f32 %v1046_v10, %v1307_v12 }
 0x308   :  { %v1048_v15 = vpop.eup %1047 }
 0x309   :  { %v409_v47 = vpop.xlane.xlu1 %408  ;;  %v424_v48 = vpop.xlane.xlu2 %423  ;;  %v434_v57 = vmul.f32 %v1048_v15, %v1305_v8  ;;  %v654_v8 = vld [vmem:[#allocation7 + $0x28] sm:$0xff] }
 0x30a   :  { %1049 = vrcp.f32 %v409_v47 }
 0x30b   :  { %1051 = vrcp.f32 %v424_v48 }
 0x310   :  { %v1050_v49 = vpop.eup %1049 }
 0x311   :  { %v1052_v50 = vpop.eup %1051  ;;  %v435_v51 = vmul.f32 %v1050_v49, %v1034_v20  ;;  %v418_v52 = vpop.xlane.xlu1 %417 }
 0x312   :  { %v1010_v53 = vpop.permute.xlu2 %1009  ;;  %v440_v54 = vmul.f32 %v1052_v50, %v1036_v21  ;;  %1053 = vrcp.f32 %v418_v52 }
 0x313   :  { %v1011_v55 = vunpack.i.l.bf16 %v1010_v53  ;;  %v1012_v56 = vunpack.i.h.bf16 %v1010_v53  ;;  %977 = vmatmul.msk.f32.vlgmr.msrb.gmra.mxu1 %vm138_vm1, %v435_v51 }
 0x314   :  { %982 = vmatmul.msk.f32.vlgmr.msra.gmra.mxu2 %vm138_vm1, %v440_v54  ;;  %721 = vmatpush.msrb.mxu1 %v651_v4 }
 0x315   :  { %488 = vmatpush.msrb.mxu0 %v1012_v56  ;;  %566 = vmatpush.msrb.mxu3 %v1011_v55 }
 0x316   :  { %976 = vmatmul.msk.f32.vlgmr.msrb.gmra.mxu0 %vm138_vm1, %v434_v57  ;;  %979 = vmatmul.msk.f32.vlgmr.msrb.gmra.mxu3 %vm138_vm1, %v437_v59 }
 0x317   :  { %592 = vmatpush.msra.mxu0 %v1021_v58  ;;  %675 = vmatpush.msra.mxu3 %v649_v60 }
 0x318   :  { %v1054_v61 = vpop.eup %1053  ;;  %836 = vmatpush.msra.mxu2 %v656_v6 }
 0x319   :  { %v421_v62 = vpop.xlane.xlu1 %420  ;;  %v438_v63 = vmul.f32 %v1054_v61, %v1316_v27  ;;  %698 = vmatpush.msrb.mxu0 %v650_v5  ;;  %767 = vmatpush.msrb.mxu3 %v653_v7 }
 0x31a   :  { %1055 = vrcp.f32 %v421_v62 }
 0x31e   :  { %980 = vmatmul.msk.f32.vlgmr.msra.gmra.mxu0 %vm138_vm1, %v438_v63 }
 0x31f   :  { %790 = vmatpush.msra.mxu0 %v654_v8 }
 0x320   :  { %v1056_v0 = vpop.eup %1055 }
 0x321   :  { %v439_v1 = vmul.f32 %v1056_v0, %v1042_v31 }
 0x323   :  { %981 = vmatmul.msk.f32.vlgmr.msra.gmra.mxu1 %vm138_vm1, %v439_v1 }
 0x324   :  { %813 = vmatpush.msra.mxu1 %v655_v9 }
 0x328   :  { %v464_v2 = vpop.f32.mrf.mxu3 }
 0x329   :  { %983 = vmatmul.msk.f32.vlgmr.msra.gmra.mxu3 %vm138_vm1, %v464_v2 }
 0x386   :  { %v542_v11 = vpop.f32.mrf.mxu2 }
 0x387   :  { %986 = vmatmul.msk.f32.vlgmr.msrb.gmra.mxu2 %vm138_vm1, %v542_v11 }
 0x390   :  { %v516_v12 = vpop.f32.mrf.mxu1 }
 0x391   :  { %985 = vmatmul.msk.f32.vlgmr.msrb.gmra.mxu1 %vm138_vm1, %v516_v12 }
 0x393   :  { %v490_v13 = vpop.f32.mrf.mxu0 }
 0x394   :  { %984 = vmatmul.msk.f32.vlgmr.msrb.gmra.mxu0 %vm138_vm1, %v490_v13 }
 0x397   :  { %v646_v14 = vpop.f32.mrf.mxu2 }
 0x398   :  { %990 = vmatmul.msk.f32.vlgmr.msra.gmra.mxu2 %vm138_vm1, %v646_v14 }
 0x399   :  { %v568_v16 = vpop.f32.mrf.mxu3 }
 0x39a   :  { %987 = vmatmul.msk.f32.vlgmr.msrb.gmra.mxu3 %vm138_vm1, %v568_v16 }
 0x39b   :  { %v594_v17 = vpop.f32.mrf.mxu0 }
 0x39c   :  { %988 = vmatmul.msk.f32.vlgmr.msra.gmra.mxu0 %vm138_vm1, %v594_v17 }
 0x3a0   :  { %v620_v18 = vpop.f32.mrf.mxu1 }
 0x3a1   :  { %989 = vmatmul.msk.f32.vlgmr.msra.gmra.mxu1 %vm138_vm1, %v620_v18 }
 0x3ac   :  { %v677_v19 = vpop.f32.mrf.mxu3 }
 0x40a   :  { %v746_v25 = vpop.f32.mrf.mxu2 }
 0x40e   :  { %v723_v22 = vpop.f32.mrf.mxu1 }
 0x411   :  { %v700_v20 = vpop.f32.mrf.mxu0 }
 0x412   :  { %v843_v21 = vadd.f32 %v700_v20, %v677_v19 }
 0x414   :  { %v844_v23 = vadd.f32 %v843_v21, %v723_v22 }
 0x416   :  { %v845_v26 = vadd.f32 %v844_v23, %v746_v25 }
 0x418   :  { %v849_v27 = vadd.f32 %v1024_v24, %v845_v26 }
 0x419   :  { %v792_v31 = vpop.f32.mrf.mxu0 }
 0x41a   :  { %v874_v28 = vrot.slane %v849_v27, 6  ;;  %v870_v29 = vrot.slane %v849_v27, 5  ;;  %v856_v30 = vrot.slane %v849_v27, 1  ;;  %v878_v37 = vrot.slane %v849_v27, 7 }
 0x41b   :  { %v838_v36 = vpop.f32.mrf.mxu2  ;;  %v860_v43 = vrot.slane %v849_v27, 2  ;;  %v864_v47 = vrot.slane %v849_v27, 3  ;;  %v868_v59 = vrot.slane %v849_v27, 4 }
 0x41c   :  { %875 = vrot.lane.b32.xlu0 %v874_v28, %s1168_s12  ;;  %871 = vrot.lane.b32.xlu2 %v870_v29, %s1169_s15 }
 0x41d   :  { %857 = vrot.lane.b32.xlu1 %v856_v30, %s1169_s15  ;;  %v769_v32 = vpop.f32.mrf.mxu3 }
 0x41e   :  { %v851_v33 = vadd.f32 %v792_v31, %v769_v32  ;;  %v815_v34 = vpop.f32.mrf.mxu1 }
 0x420   :  { %v852_v35 = vadd.f32 %v851_v33, %v815_v34 }
 0x422   :  { %v853_v38 = vadd.f32 %v852_v35, %v838_v36 }
 0x424   :  { %879 = vrot.lane.b32.xlu0 %v878_v37, %s1167_s2  ;;  %v854_v39 = vadd.f32 %v1024_v24, %v853_v38 }
 0x426   :  { %v913_v40 = vrot.slane %v854_v39, 7  ;;  %v905_v41 = vrot.slane %v854_v39, 5  ;;  %v909_v42 = vrot.slane %v854_v39, 6  ;;  %v895_v44 = vrot.slane %v854_v39, 2 }
 0x427   :  { %v891_v45 = vrot.slane %v854_v39, 1  ;;  %v899_v46 = vrot.slane %v854_v39, 3  ;;  %v903_v53 = vrot.slane %v854_v39, 4 }
 0x428   :  { %914 = vrot.lane.b32.xlu2 %v913_v40, %s1167_s2  ;;  %906 = vrot.lane.b32.xlu1 %v905_v41, %s1169_s15 }
 0x42c   :  { %910 = vrot.lane.b32.xlu0 %v909_v42, %s1168_s12 }
 0x430   :  { %861 = vrot.lane.b32.xlu1 %v860_v43, %s1168_s12  ;;  %896 = vrot.lane.b32.xlu2 %v895_v44, %s1168_s12 }
 0x434   :  { %892 = vrot.lane.b32.xlu0 %v891_v45, %s1169_s15 }
 0x438   :  { %900 = vrot.lane.b32.xlu2 %v899_v46, %s1167_s2 }
 0x43c   :  { %865 = vrot.lane.b32.xlu0 %v864_v47, %s1167_s2 }
 0x476   :  { %v872_v48 = vpop.permute.xlu2 %871 }
 0x477   :  { %v887_v63 = vsel %vm78_vm0, %v868_v59, %v872_v48 }
 0x482   :  { %v915_v15 = vpop.permute.xlu2 %914 }
 0x48a   :  { %v897_v54 = vpop.permute.xlu2 %896 }
 0x48e   :  { %v876_v10 = vpop.permute.xlu0 %875 }
 0x48f   :  { %v858_v49 = vpop.permute.xlu1 %857  ;;  %v888_v0 = vsel %vm883_vm2, %v887_v63, %v876_v10 }
 0x490   :  { %v882_v6 = vsel %vm78_vm0, %v849_v27, %v858_v49 }
 0x492   :  { %v901_v1 = vpop.permute.xlu2 %900 }
 0x496   :  { %v880_v50 = vpop.permute.xlu0 %879 }
 0x497   :  { %v889_v2 = vsel %vm885_vm3, %v888_v0, %v880_v50 }
 0x49a   :  { %v907_v51 = vpop.permute.xlu1 %906 }
 0x49b   :  { %v920_v55 = vsel %vm78_vm0, %v903_v53, %v907_v51 }
 0x49e   :  { %v911_v52 = vpop.permute.xlu0 %910 }
 0x49f   :  { %v921_v56 = vsel %vm883_vm2, %v920_v55, %v911_v52 }
 0x4a0   :  { %v922_v57 = vsel %vm885_vm3, %v921_v56, %v915_v15 }
 0x4a1   :  { %v926_v61 = vrot.slane %v922_v57, 7 }
 0x4a2   :  { %v862_v3 = vpop.permute.xlu1 %861 }
 0x4a3   :  { %v931_v5 = vsel %vm929_vm4, %v889_v2, %v926_v61  ;;  %v884_v7 = vsel %vm883_vm2, %v882_v6, %v862_v3 }
 0x4a4   :  { %v934_v11 = vrot.slane %v931_v5, 6 }
 0x4a6   :  { %v893_v58 = vpop.permute.xlu0 %892 }
 0x4a7   :  { %v917_v60 = vsel %vm78_vm0, %v854_v39, %v893_v58 }
 0x4a8   :  { %v918_v62 = vsel %vm883_vm2, %v917_v60, %v897_v54 }
 0x4a9   :  { %v919_v4 = vsel %vm885_vm3, %v918_v62, %v901_v1 }
 0x4aa   :  { %v925_v8 = vrot.slane %v919_v4, 7 }
 0x4ae   :  { %v866_v9 = vpop.permute.xlu0 %865 }
 0x4af   :  { %v886_v12 = vsel %vm885_vm3, %v884_v7, %v866_v9 }
 0x4b0   :  { %v930_v13 = vsel %vm929_vm4, %v886_v12, %v925_v8 }
 0x4b1   :  { %v936_v14 = vsel %vm935_vm5, %v930_v13, %v934_v11 }
 0x4b2   :  { %938 = vst [vmem:[#allocation8] sm:$0xf] %v936_v14 }
 0x4b3   :  { %949 = dma.vmem_to_hbm [thread:$0]  %s945_s16, 64, %s947_s19, [#allocation4]  }
 0x4b4   :  { %1157 = dma.done.wait [#allocation4], 64  }
 0x4b5   :  { %1158 = vsyncadd [#allocation4], 4294967232 }
 0x4b6   :  { %954 = vsyncpa [#allocation3], 1 }
 0x4b7   :  { %955 = vsyncpa [#allocation6], 1 }
 0x4b8   :  { %956 = vsyncpa [#allocation4], 1 }

</bundles_post_ra>
